<compile_context>
chip_gen: v6e
topology: v6e:2x2x1
jax: 0.10.0
libtpu: 0.0.40
codegen_flags: <defaults>
</compile_context>

<pallas_src>
import functools

import jax
import jax.numpy as jnp
from jax.experimental import pallas as pl
from jax.experimental.pallas import tpu as pltpu


def _round_up(n, m):
    return ((n + m - 1) // m) * m


def _cdiv(a, b):
    return -(-a // b)


def _lanes(n):
    return _round_up(n, 128)


def _network_kernel(x_ref, w1_ref, b1_ref, w2_ref, b2_ref, o_ref):
    # hidden = x @ W1 + b1   (MXU matmul, f32 accumulation)
    x = x_ref[...].astype(w1_ref.dtype)   # no-op for f32; in-kernel cast if bf16 weights
    h = jnp.dot(x, w1_ref[...], preferred_element_type=jnp.float32)
    h = h + b1_ref[...]                   # (TB, H) + (1, H) broadcast
    # out = hidden @ W2 + b2
    o = jnp.dot(h.astype(w2_ref.dtype), w2_ref[...],
                preferred_element_type=jnp.float32)
    o = o + b2_ref[...]                   # (TB, A) + (1, A) broadcast
    o_ref[...] = o.astype(o_ref.dtype)


@functools.partial(jax.jit, static_argnames=("block_b", "compute_dtype"))
def network_forward(x, w1, b1, w2, b2, *, block_b=None, compute_dtype=None):
    """Fused two-layer linear forward.

    x  : (B, obs_dim)        float32 (or bf16 upstream for max HBM bandwidth)
    w1 : (obs_dim, hidden)   float32   (transposed PyTorch weight)
    b1 : (hidden,)           float32
    w2 : (hidden, actions)   float32   (transposed PyTorch weight)
    b2 : (actions,)          float32
    block_b       : optional batch-tile override (rounded up to a multiple of 8).
    compute_dtype : optionally cast the weights (e.g. jnp.bfloat16); x is cast
                    in-kernel, accumulation stays f32.  Note this quantizes the
                    hidden activations, so loosen tolerances on that path.
    returns (B, actions) float32
    """
    B, obs = x.shape
    hidden = w1.shape[1]
    actions = w2.shape[1]

    if compute_dtype is not None:
        # Weights only (tiny, one-time). x is cast inside the kernel (free VPU
        # op) to avoid an extra full HBM pass over the activation stream.
        w1 = w1.astype(compute_dtype)
        w2 = w2.astype(compute_dtype)
    dsz = jnp.dtype(w1.dtype).itemsize

    b1 = b1.reshape(1, hidden).astype(jnp.float32)
    b2 = b2.reshape(1, actions).astype(jnp.float32)

    # ---- batch tile selection -------------------------------------------
    B8 = _round_up(B, 8)
    if block_b is not None:
        tb_target = _round_up(int(block_b), 8)
    else:
        # Each grid step should move >= ~2 MiB of x; clamp to [512, 8192] rows.
        tb_target = _round_up(min(8192, max(512, (2 << 20) // max(1, obs * dsz))), 8)

    # VMEM cap per row (lane-padded widths: double-buffered x/out + f32 temps).
    per_row = (2 * _lanes(obs) * dsz          # x, double buffered
               + 3 * _lanes(actions) * 4      # out (x2) + f32 result temp
               + 2 * _lanes(hidden) * 4)      # f32 hidden temporaries
    tb_cap = max(8, ((36 << 20) // per_row) // 8 * 8)
    tb_target = min(tb_target, tb_cap, B8)

    num_tiles = _cdiv(B8, tb_target)
    if num_tiles == 1 and B8 >= 256:
        num_tiles = 2                         # keep both v7x TensorCores busy
    TB = _round_up(_cdiv(B8, num_tiles), 8)   # last tile stays nearly full
    B_p = num_tiles * TB

    if B_p != B:
        x = jnp.pad(x, ((0, B_p - B), (0, 0)))

    # ---- scoped-VMEM budget ----------------------------------------------
    w_bytes = 2 * (_round_up(obs, 8) * _lanes(hidden) * dsz
                   + _round_up(hidden, 8) * _lanes(actions) * dsz
                   + _lanes(hidden) * 4 + _lanes(actions) * 4)
    vmem_est = TB * per_row + w_bytes
    vmem_limit = int(min(max(vmem_est + (8 << 20), 32 << 20), 56 << 20))

    out = pl.pallas_call(
        _network_kernel,
        out_shape=jax.ShapeDtypeStruct((B_p, actions), jnp.float32),
        grid_spec=pl.GridSpec(
            grid=(num_tiles,),
            in_specs=[
                # x: one batch tile per grid step; last dim = full obs extent
                # (no lane padding in HBM, Mosaic pads in VMEM).
                pl.BlockSpec((TB, obs), lambda i: (i, 0)),
                # Weights / biases: constant index_map -> VMEM-resident.
                pl.BlockSpec((obs, hidden), lambda i: (0, 0)),
                pl.BlockSpec((1, hidden), lambda i: (0, 0)),
                pl.BlockSpec((hidden, actions), lambda i: (0, 0)),
                pl.BlockSpec((1, actions), lambda i: (0, 0)),
            ],
            # Full-width (actions) output block: no padded writes, no re-slice.
            out_specs=pl.BlockSpec((TB, actions), lambda i: (i, 0)),
        ),
        compiler_params=pltpu.CompilerParams(
            # Batch tiles are independent -> shard across TCs (v7x megacore).
            dimension_semantics=("parallel",),
            vmem_limit_bytes=vmem_limit,
        ),
    )(x, w1, b1, w2, b2)

    return out[:B] if B_p != B else out


def init_params(key, obs_dim, hidden_dim, actions_dim):
    """Deterministic init mimicking torch.nn.Linear default (U[-1/sqrt(in), 1/sqrt(in)])."""
    k1, k2, k3, k4 = jax.random.split(key, 4)
    bound1 = 1.0 / jnp.sqrt(obs_dim)
    bound2 = 1.0 / jnp.sqrt(hidden_dim)
    # Stored already transposed: (in, out)
    w1 = jax.random.uniform(k1, (obs_dim, hidden_dim), jnp.float32, -bound1, bound1)
    b1 = jax.random.uniform(k2, (hidden_dim,), jnp.float32, -bound1, bound1)
    w2 = jax.random.uniform(k3, (hidden_dim, actions_dim), jnp.float32, -bound2, bound2)
    b2 = jax.random.uniform(k4, (actions_dim,), jnp.float32, -bound2, bound2)
    return w1, b1, w2, b2


if __name__ == "__main__":
    # Small shapes consistent with the module (obs -> hidden -> actions).
    B, OBS, HIDDEN, ACTIONS = 8, 32, 64, 8

    key = jax.random.PRNGKey(0)
    kx, kp = jax.random.split(key)
    x = jax.random.normal(kx, (B, OBS), jnp.float32)
    w1, b1, w2, b2 = init_params(kp, OBS, HIDDEN, ACTIONS)

    out = network_forward(x, w1, b1, w2, b2)
    out = jax.block_until_ready(out)

    # Reference check in plain JAX.
    ref = (x @ w1 + b1) @ w2 + b2
    assert out.shape == (B, ACTIONS)
    assert jnp.allclose(out, ref, atol=1e-5, rtol=1e-5)

    # Also exercise a ragged / multi-tile batch path.
    B2 = 600
    x2 = jax.random.normal(kx, (B2, OBS), jnp.float32)
    out2 = jax.block_until_ready(network_forward(x2, w1, b1, w2, b2, block_b=256))
    ref2 = (x2 @ w1 + b1) @ w2 + b2
    assert out2.shape == (B2, ACTIONS)
    assert jnp.allclose(out2, ref2, atol=1e-5, rtol=1e-5)

    print("KERNEL_OK")
</pallas_src>

<mosaic_0001>
module attributes {stable_mosaic.version = 11 : i64} {
  func.func @_network_kernel(%arg0: i32, %arg1: memref<8x32xf32, #tpu.memory_space<vmem>>, %arg2: memref<32x64xf32, #tpu.memory_space<vmem>>, %arg3: memref<1x64xf32, #tpu.memory_space<vmem>>, %arg4: memref<64x8xf32, #tpu.memory_space<vmem>>, %arg5: memref<1x8xf32, #tpu.memory_space<vmem>>, %arg6: memref<8x8xf32, #tpu.memory_space<vmem>>) attributes {dimension_semantics = [#tpu.dimension_semantics<parallel>], iteration_bounds = array<i64: 1>, scalar_prefetch = 0 : i64, scratch_operands = 0 : i64, tpu.core_type = #tpu.core_type<tc>, window_params = [{transform_indices = @transform_0, window_bounds = array<i64: 8, 32>}, {pipeline_mode = #tpu.pipeline_mode<synchronous>, transform_indices = @transform_1, window_bounds = array<i64: 32, 64>}, {pipeline_mode = #tpu.pipeline_mode<synchronous>, transform_indices = @transform_2, window_bounds = array<i64: 1, 64>}, {pipeline_mode = #tpu.pipeline_mode<synchronous>, transform_indices = @transform_3, window_bounds = array<i64: 64, 8>}, {pipeline_mode = #tpu.pipeline_mode<synchronous>, transform_indices = @transform_4, window_bounds = array<i64: 1, 8>}, {transform_indices = @transform_5, window_bounds = array<i64: 8, 8>}]} {
    %c0 = arith.constant 0 : index
    %c0_0 = arith.constant 0 : index
    %0 = vector.load %arg1[%c0, %c0_0] : memref<8x32xf32, #tpu.memory_space<vmem>>, vector<8x32xf32>
    %c0_1 = arith.constant 0 : index
    %c0_2 = arith.constant 0 : index
    %1 = vector.load %arg2[%c0_1, %c0_2] : memref<32x64xf32, #tpu.memory_space<vmem>>, vector<32x64xf32>
    %cst = arith.constant dense<0.000000e+00> : vector<8x64xf32>
    %2 = tpu.matmul %0, %1, %cst {dimension_numbers = #tpu.dot_dimension_numbers<[1], [0], [0], [1], [0, 0, 1, 1], [], []>} : vector<8x32xf32>, vector<32x64xf32>, vector<8x64xf32> -> vector<8x64xf32>
    %c0_3 = arith.constant 0 : index
    %c0_4 = arith.constant 0 : index
    %3 = vector.load %arg3[%c0_3, %c0_4] : memref<1x64xf32, #tpu.memory_space<vmem>>, vector<1x64xf32>
    %4 = vector.broadcast %3 : vector<1x64xf32> to vector<8x64xf32>
    %5 = arith.addf %2, %4 : vector<8x64xf32>
    %c0_5 = arith.constant 0 : index
    %c0_6 = arith.constant 0 : index
    %6 = vector.load %arg4[%c0_5, %c0_6] : memref<64x8xf32, #tpu.memory_space<vmem>>, vector<64x8xf32>
    %cst_7 = arith.constant dense<0.000000e+00> : vector<8x8xf32>
    %7 = tpu.matmul %5, %6, %cst_7 {dimension_numbers = #tpu.dot_dimension_numbers<[1], [0], [0], [1], [0, 0, 1, 1], [], []>} : vector<8x64xf32>, vector<64x8xf32>, vector<8x8xf32> -> vector<8x8xf32>
    %c0_8 = arith.constant 0 : index
    %c0_9 = arith.constant 0 : index
    %8 = vector.load %arg5[%c0_8, %c0_9] : memref<1x8xf32, #tpu.memory_space<vmem>>, vector<1x8xf32>
    %9 = vector.broadcast %8 : vector<1x8xf32> to vector<8x8xf32>
    %10 = arith.addf %7, %9 : vector<8x8xf32>
    %c0_10 = arith.constant 0 : index
    %c0_11 = arith.constant 0 : index
    %11 = vector.load %arg6[%c0_10, %c0_11] : memref<8x8xf32, #tpu.memory_space<vmem>>, vector<8x8xf32>
    tpu.vector_store %arg6[%c0_10, %c0_11], %10 {strides = array<i32>} : memref<8x8xf32, #tpu.memory_space<vmem>>, vector<8x8xf32>,
    return
  }
  func.func @transform_0(%arg0: i32) -> (i32, i32) {
    %c0_i32 = arith.constant 0 : i32
    %c0_i32_0 = arith.constant 0 : i32
    return %arg0, %c0_i32 : i32, i32
  }
  func.func @transform_1(%arg0: i32) -> (i32, i32) {
    %c0_i32 = arith.constant 0 : i32
    %c0_i32_0 = arith.constant 0 : i32
    %c0_i32_1 = arith.constant 0 : i32
    return %c0_i32, %c0_i32_0 : i32, i32
  }
  func.func @transform_2(%arg0: i32) -> (i32, i32) {
    %c0_i32 = arith.constant 0 : i32
    %c0_i32_0 = arith.constant 0 : i32
    %c0_i32_1 = arith.constant 0 : i32
    return %c0_i32, %c0_i32_0 : i32, i32
  }
  func.func @transform_3(%arg0: i32) -> (i32, i32) {
    %c0_i32 = arith.constant 0 : i32
    %c0_i32_0 = arith.constant 0 : i32
    %c0_i32_1 = arith.constant 0 : i32
    return %c0_i32, %c0_i32_0 : i32, i32
  }
  func.func @transform_4(%arg0: i32) -> (i32, i32) {
    %c0_i32 = arith.constant 0 : i32
    %c0_i32_0 = arith.constant 0 : i32
    %c0_i32_1 = arith.constant 0 : i32
    return %c0_i32, %c0_i32_0 : i32, i32
  }
  func.func @transform_5(%arg0: i32) -> (i32, i32) {
    %c0_i32 = arith.constant 0 : i32
    %c0_i32_0 = arith.constant 0 : i32
    return %arg0, %c0_i32 : i32, i32
  }
}

</mosaic_0001>

<bundles_post_ra>
// kernel: network_forward.1
= control target key start
LH: loop header
LB: loop body
LE: loop exit
PB: predicated region body
PF: predicated region fallthrough
CT: control target
= control target key end

     0   :  { %v285_v1 = vmov 0.0   ;;  %vm286_vm0 = vmmov 0   ;;  %s368_s0 = inlined_call_operand.vmem [shape: f32[8,32], index: 0, kind: input, shape index: {}]   ;;  %s369_s1 = inlined_call_operand.vmem [shape: f32[32,64], index: 1, kind: input, shape index: {}]   ;;  %s370_s2 = inlined_call_operand.vmem [shape: f32[1,64], index: 2, kind: input, shape index: {}]   ;;  %s371_s3 = inlined_call_operand.vmem [shape: f32[64,8], index: 3, kind: input, shape index: {}]   ;;  %s372_s4 = inlined_call_operand.vmem [shape: f32[1,8], index: 4, kind: input, shape index: {}]   ;;  %s373_s5 = inlined_call_operand.hbm [shape: f32[8,8], index: 5, kind: output, shape index: {}]  }
   0x1   :  { %v25_v0 = vld [vmem:[%s369_s1 + $0x18] sm:$0xff]  ;;  %230 = vmatprep.subr.mxu0 %v285_v1  ;;  %v24_v2 = vld [vmem:[%s369_s1 + $0x10] sm:$0xff]  ;;  %238 = vmatprep.mubr.msk.f32.mxu0 %vm286_vm0, %v285_v1  ;;  %v23_v5 = vld [vmem:[%s369_s1 + $0x8] sm:$0xff] }
   0x2   :  { %v114_v3 = vld [vmem:[%s371_s3 + $0x38] sm:$0xff]  ;;  %231 = vmatpush3.msra.mxu0 %v25_v0  ;;  %241 = vmatprep.subr.mxu1 %v285_v1  ;;  %v113_v4 = vld [vmem:[%s371_s3 + $0x30] sm:$0xff]  ;;  %v112_v6 = vld [vmem:[%s371_s3 + $0x28] sm:$0xff] }
   0x3   :  { %232 = vmatprep.subr.mxu0 %v285_v1  ;;  %242 = vmatpush3.msra.mxu1 %v114_v3 }
   0x4   :  { %233 = vmatpush3.msra.mxu0 %v24_v2  ;;  %243 = vmatprep.subr.mxu1 %v285_v1 }
   0x5   :  { %10 = vsyncpa [#allocation3], 0  ;;  %234 = vmatprep.subr.mxu0 %v285_v1  ;;  %v22_v7 = vld [vmem:[%s369_s1] sm:$0xff]  ;;  %244 = vmatpush3.msra.mxu1 %v113_v4  ;;  %vm33_vm1 = vcmask 261120   ;;  %v110_v10 = vld [vmem:[%s371_s3 + $0x18] sm:$0xff]  ;;  %vm122_vm2 = vcmask 523264  }
   0x6   :  { %235 = vmatpush3.msra.mxu0 %v23_v5  ;;  %v21_v8 = vld [vmem:[%s368_s0] sm:$0xff]  ;;  %245 = vmatprep.subr.mxu1 %v285_v1  ;;  %v109_v11 = vld [vmem:[%s371_s3 + $0x10] sm:$0xff]  ;;  %v108_v12 = vld [vmem:[%s371_s3 + $0x8] sm:$0xff]  ;;  %s287_s21 = smov [#allocation2]   ;;  %vm196_vm3 = vcmask 64512  }
   0x7   :  { %v111_v9 = vld [vmem:[%s371_s3 + $0x20] sm:$0xff]  ;;  %236 = vmatprep.subr.mxu0 %v285_v1  ;;  %246 = vmatpush3.msra.mxu1 %v112_v6  ;;  %s204_s22 = sshll.u32 %s287_s21, 4  ;;  %s205_s22 = int_to_ptr.vmem [resolvable:$true] %s204_s22 }
   0x8   :  { %237 = vmatpush3.msra.mxu0 %v22_v7  ;;  %247 = vmatprep.subr.mxu1 %v285_v1  ;;  %v107_v13 = vld [vmem:[%s371_s3] sm:$0xff]  ;;  %s263_s3 = scalar_lea.vmem %s205_s22, 128  ;;  %p268_p1 = scmp.lt.s32.totalorder %s205_s22, %s205_s22 }
   0x9   :  { %239 = vmatmul.mubr.msk.f32.vlgmr.msra.gmra.mxu0 %vm33_vm1, %v21_v8  ;;  %248 = vmatpush3.msra.mxu1 %v111_v9  ;;  %v212_v14 = vld [vmem:[%s370_s2] ss:$0 sm:$0xff]  ;;  %p264_p0 = scmp.ne.s32.totalorder %s205_s22, %s263_s3  ;;  %p269_p2 = scmp.lt.s32.totalorder %s263_s3, %s263_s3 }
   0xa   :  { %249 = vmatprep.subr.mxu1 %v285_v1  ;;  %257 = vmatprep.mubr.msk.f32.mxu1 %vm286_vm0, %v285_v1  ;;  %v214_v18 = vld [vmem:[%s372_s4] ss:$0 sm:$0xff] }
   0xb   :  { %250 = vmatpush3.msra.mxu1 %v110_v10  ;;  %p270_p3 = por %p269_p2, %p268_p1 }
   0xc   :  { %251 = vmatprep.subr.mxu1 %v285_v1 }
   0xd   :  { %252 = vmatpush3.msra.mxu1 %v109_v11  ;;  %p271_p4 = pnand %p270_p3, %p264_p0 }
   0xe   :  { %253 = vmatprep.subr.mxu1 %v285_v1 }
   0xf   :  { %254 = vmatpush3.msra.mxu1 %v108_v12 }
  0x10   :  { %255 = vmatprep.subr.mxu1 %v285_v1 }
  0x11   :  { %256 = vmatpush3.msra.mxu1 %v107_v13 }
  0xc9   :  { %v103_v15 = vpop.f32.mrf.mxu0 }
  0xca   :  { %v104_v16 = vadd.f32 %v212_v14, %v103_v15 }
  0xcb   :  { %v240_v17 = vpop.f32.mrf.mxu0 }
  0xcc   :  { %258 = vmatmul.mubr.msk.f32.vlgmr.msra.gmra.mxu1 %vm122_vm2, %v104_v16 }
 0x18c   :  { %v192_v19 = vpop.f32.mrf.mxu1 }
 0x18d   :  { %v193_v20 = vadd.f32 %v214_v18, %v192_v19 }
 0x18e   :  { %v259_v21 = vpop.f32.mrf.mxu1 }
 0x18f   :  { %197 = vst.msk [vmem:[#allocation2] sm:$0xff] %vm196_vm3, %v193_v20 }
 0x190   :  { %274 = shalt.err (!%p271_p4)
}
 0x191   :  { %207 = dma.vmem_to_hbm [thread:$0]  %s205_s22, 128, %s373_s5, [#allocation3]  }
 0x192   :  { %283 = dma.done.wait [#allocation3], 128  }
 0x193   :  { %284 = vsyncadd [#allocation3], 4294967168 }
 0x194   :  { %211 = vsyncpa [#allocation3], 1 }

</bundles_post_ra>
